<compile_context>
chip_gen: v7x
topology: tpu7x:2x2x1
jax: 0.10.0
libtpu: 0.0.40
codegen_flags: <defaults>
</compile_context>

<pallas_src>
import math
import functools

import jax
import jax.numpy as jnp
from jax.experimental import pallas as pl
from jax.experimental.pallas import tpu as pltpu


def _attn_kernel(x_ref, mask_ref,
                 wq_ref, bq_ref, wk_ref, bk_ref, wv_ref, bv_ref,
                 e_ref, wff_ref, bff_ref,
                 out_ref, *, num_head, head_dim):
    x = x_ref[0]          # [S, dim]
    m = mask_ref[0]       # [S, 1]

    # Fused Q/K/V projections for ALL heads (contraction dim = dim, not head_dim).
    q = jnp.dot(x, wq_ref[...], preferred_element_type=jnp.float32) + bq_ref[...]  # [S, H*Dh]
    k = jnp.dot(x, wk_ref[...], preferred_element_type=jnp.float32) + bk_ref[...]  # [S, H*Dh]
    v = jnp.dot(x, wv_ref[...], preferred_element_type=jnp.float32) + bv_ref[...]  # [S, H*Dh]

    km = k * m
    vm = v * m

    scale = 1.0 / math.sqrt(head_dim)
    ctx_parts = []
    # Small static unroll over heads (H=4); slices are static lane sub-selects.
    for h in range(num_head):
        lo = h * head_dim
        hi = lo + head_dim
        qh = q[:, lo:hi]                                                   # [S, Dh]
        kh = km[:, lo:hi]
        vh = vm[:, lo:hi]
        e = e_ref[h]                                                       # [k_lin, S]
        kp = jnp.dot(e, kh, preferred_element_type=jnp.float32)            # [k_lin, Dh]
        vp = jnp.dot(e, vh, preferred_element_type=jnp.float32)            # [k_lin, Dh]
        dot = jnp.dot(qh, kp.T, preferred_element_type=jnp.float32) * scale  # [S, k_lin]
        dot_max = jnp.max(dot, axis=-1, keepdims=True)
        p = jnp.exp(dot - dot_max)
        attn = p * pl.reciprocal(jnp.sum(p, axis=-1, keepdims=True), approx=True)
        ctx_parts.append(jnp.dot(attn, vp, preferred_element_type=jnp.float32))  # [S, Dh]

    ctx = jnp.concatenate(ctx_parts, axis=-1)                              # [S, H*Dh]
    out = jnp.dot(ctx, wff_ref[...], preferred_element_type=jnp.float32) + bff_ref[...]
    out_ref[0] = out.astype(out_ref.dtype)


def attention_forward(X, mask, params, *, num_head, head_dim):
    """X: [B, S, dim] f32, mask: [B, S] f32 -> [B, S, dim] f32."""
    B, S, dim = X.shape
    Wq, bq = params["Wq"], params["bq"]        # [dim, H*Dh], [1, H*Dh]
    Wk, bk = params["Wk"], params["bk"]
    Wv, bv = params["Wv"], params["bv"]
    E = params["E"]                            # [H, k_lin, S]
    Wff, bff = params["Wff"], params["bff"]    # [H*Dh, dim], [1, dim]
    H = num_head
    Dh = head_dim
    HD = H * Dh
    k_lin = E.shape[1]

    mask3 = mask.reshape(B, S, 1).astype(jnp.float32)

    kernel = functools.partial(_attn_kernel, num_head=H, head_dim=Dh)

    # Constant-index (fully resident) specs for all weights: DMA'd once, stay in VMEM.
    w_spec_qkv = pl.BlockSpec((dim, HD), lambda b: (0, 0))
    b_spec_qkv = pl.BlockSpec((1, HD), lambda b: (0, 0))

    return pl.pallas_call(
        kernel,
        out_shape=jax.ShapeDtypeStruct((B, S, dim), jnp.float32),
        grid_spec=pltpu.PrefetchScalarGridSpec(
            num_scalar_prefetch=0,
            grid=(B,),
            in_specs=[
                pl.BlockSpec((1, S, dim), lambda b: (b, 0, 0)),    # X
                pl.BlockSpec((1, S, 1),   lambda b: (b, 0, 0)),    # mask
                w_spec_qkv,                                        # Wq
                b_spec_qkv,                                        # bq
                w_spec_qkv,                                        # Wk
                b_spec_qkv,                                        # bk
                w_spec_qkv,                                        # Wv
                b_spec_qkv,                                        # bv
                pl.BlockSpec((H, k_lin, S), lambda b: (0, 0, 0)),  # E
                pl.BlockSpec((HD, dim), lambda b: (0, 0)),         # Wff
                pl.BlockSpec((1, dim),  lambda b: (0, 0)),         # bff
            ],
            out_specs=pl.BlockSpec((1, S, dim), lambda b: (b, 0, 0)),
        ),
        compiler_params=pltpu.CompilerParams(
            dimension_semantics=("parallel",),
        ),
    )(X, mask3, Wq, bq, Wk, bk, Wv, bv, E, Wff, bff)


def attention_reference(X, mask, params, *, num_head, head_dim):
    """Pure-JAX reference mirroring the PyTorch forward."""
    B, S, dim = X.shape
    H, Dh = num_head, head_dim
    # nn.Linear projections, then split_heads.
    Q = (X @ params["Wq"] + params["bq"]).reshape(B, S, H, Dh).transpose(0, 2, 1, 3)
    K = (X @ params["Wk"] + params["bk"]).reshape(B, S, H, Dh).transpose(0, 2, 1, 3)
    V = (X @ params["Wv"] + params["bv"]).reshape(B, S, H, Dh).transpose(0, 2, 1, 3)
    m = mask[:, None, :, None]
    Kp = jnp.einsum("hks,bhse->bhke", params["E"], K * m)
    Vp = jnp.einsum("hks,bhse->bhke", params["E"], V * m)
    dot = jnp.einsum("bhse,bhke->bhsk", Q, Kp) / math.sqrt(Dh)
    attn = jax.nn.softmax(dot, axis=-1)
    ctx = jnp.einsum("bhsk,bhke->bhse", attn, Vp)
    ctx = ctx.transpose(0, 2, 1, 3).reshape(B, S, H * Dh)   # combine_heads
    out = ctx @ params["Wff"] + params["bff"]
    return out


if __name__ == "__main__":
    # Config: dim=32, num_head=4, head_dim=8, linformer_k=4, max_seq_len=8
    B, S, dim = 2, 8, 32
    H, Dh, k_lin = 4, 8, 4
    HD = H * Dh

    key = jax.random.PRNGKey(0)
    keys = jax.random.split(key, 12)

    scale = 0.05
    params = {
        "Wq": scale * jax.random.normal(keys[0], (dim, HD), jnp.float32),
        "bq": scale * jax.random.normal(keys[1], (1, HD), jnp.float32),
        "Wk": scale * jax.random.normal(keys[2], (dim, HD), jnp.float32),
        "bk": scale * jax.random.normal(keys[3], (1, HD), jnp.float32),
        "Wv": scale * jax.random.normal(keys[4], (dim, HD), jnp.float32),
        "bv": scale * jax.random.normal(keys[5], (1, HD), jnp.float32),
        # E ~ randn(H, k, S) / sqrt(k), as in the module __init__.
        "E": jax.random.normal(keys[6], (H, k_lin, S), jnp.float32) / math.sqrt(k_lin),
        "Wff": scale * jax.random.normal(keys[7], (HD, dim), jnp.float32),
        "bff": scale * jax.random.normal(keys[8], (1, dim), jnp.float32),
    }

    X = jax.random.normal(keys[9], (B, S, dim), jnp.float32)
    # 0/1 padding mask
    mask = (jax.random.uniform(keys[10], (B, S)) > 0.25).astype(jnp.float32)

    out = attention_forward(X, mask, params, num_head=H, head_dim=Dh)
    out = jax.block_until_ready(out)

    ref = attention_reference(X, mask, params, num_head=H, head_dim=Dh)
    assert out.shape == (B, S, dim)
    # Tolerance slightly relaxed vs exact softmax because of approx reciprocal (EUP vrcp).
    assert jnp.allclose(out, ref, atol=2e-4, rtol=2e-4), "mismatch vs reference"

    print("KERNEL_OK")
</pallas_src>

<mosaic_0001>
module attributes {stable_mosaic.version = 11 : i64} {
  func.func @_attn_kernel(%arg0: i32, %arg1: memref<1x8x32xf32, #tpu.memory_space<vmem>>, %arg2: memref<1x8x1xf32, #tpu.memory_space<vmem>>, %arg3: memref<32x32xf32, #tpu.memory_space<vmem>>, %arg4: memref<1x32xf32, #tpu.memory_space<vmem>>, %arg5: memref<32x32xf32, #tpu.memory_space<vmem>>, %arg6: memref<1x32xf32, #tpu.memory_space<vmem>>, %arg7: memref<32x32xf32, #tpu.memory_space<vmem>>, %arg8: memref<1x32xf32, #tpu.memory_space<vmem>>, %arg9: memref<4x4x8xf32, #tpu.memory_space<vmem>>, %arg10: memref<32x32xf32, #tpu.memory_space<vmem>>, %arg11: memref<1x32xf32, #tpu.memory_space<vmem>>, %arg12: memref<1x8x32xf32, #tpu.memory_space<vmem>>) attributes {dimension_semantics = [#tpu.dimension_semantics<parallel>], iteration_bounds = array<i64: 2>, scalar_prefetch = 0 : i64, scratch_operands = 0 : i64, tpu.core_type = #tpu.core_type<tc>, window_params = [{transform_indices = @transform_0, window_bounds = array<i64: 1, 8, 32>}, {transform_indices = @transform_1, window_bounds = array<i64: 1, 8, 1>}, {pipeline_mode = #tpu.pipeline_mode<synchronous>, transform_indices = @transform_2, window_bounds = array<i64: 32, 32>}, {pipeline_mode = #tpu.pipeline_mode<synchronous>, transform_indices = @transform_3, window_bounds = array<i64: 1, 32>}, {pipeline_mode = #tpu.pipeline_mode<synchronous>, transform_indices = @transform_4, window_bounds = array<i64: 32, 32>}, {pipeline_mode = #tpu.pipeline_mode<synchronous>, transform_indices = @transform_5, window_bounds = array<i64: 1, 32>}, {pipeline_mode = #tpu.pipeline_mode<synchronous>, transform_indices = @transform_6, window_bounds = array<i64: 32, 32>}, {pipeline_mode = #tpu.pipeline_mode<synchronous>, transform_indices = @transform_7, window_bounds = array<i64: 1, 32>}, {pipeline_mode = #tpu.pipeline_mode<synchronous>, transform_indices = @transform_8, window_bounds = array<i64: 4, 4, 8>}, {pipeline_mode = #tpu.pipeline_mode<synchronous>, transform_indices = @transform_9, window_bounds = array<i64: 32, 32>}, {pipeline_mode = #tpu.pipeline_mode<synchronous>, transform_indices = @transform_10, window_bounds = array<i64: 1, 32>}, {transform_indices = @transform_11, window_bounds = array<i64: 1, 8, 32>}]} {
    %c0 = arith.constant 0 : index
    %c0_0 = arith.constant 0 : index
    %c0_1 = arith.constant 0 : index
    %0 = vector.load %arg1[%c0, %c0_0, %c0_1] : memref<1x8x32xf32, #tpu.memory_space<vmem>>, vector<1x8x32xf32>
    %1 = vector.shape_cast %0 : vector<1x8x32xf32> to vector<8x32xf32>
    %c0_2 = arith.constant 0 : index
    %c0_3 = arith.constant 0 : index
    %c0_4 = arith.constant 0 : index
    %2 = vector.load %arg2[%c0_2, %c0_3, %c0_4] : memref<1x8x1xf32, #tpu.memory_space<vmem>>, vector<1x8x1xf32>
    %3 = vector.shape_cast %2 : vector<1x8x1xf32> to vector<8x1xf32>
    %c0_5 = arith.constant 0 : index
    %c0_6 = arith.constant 0 : index
    %4 = vector.load %arg3[%c0_5, %c0_6] : memref<32x32xf32, #tpu.memory_space<vmem>>, vector<32x32xf32>
    %cst = arith.constant dense<0.000000e+00> : vector<8x32xf32>
    %5 = tpu.matmul %1, %4, %cst {dimension_numbers = #tpu.dot_dimension_numbers<[1], [0], [0], [1], [0, 0, 1, 1], [], []>} : vector<8x32xf32>, vector<32x32xf32>, vector<8x32xf32> -> vector<8x32xf32>
    %c0_7 = arith.constant 0 : index
    %c0_8 = arith.constant 0 : index
    %6 = vector.load %arg4[%c0_7, %c0_8] : memref<1x32xf32, #tpu.memory_space<vmem>>, vector<1x32xf32>
    %7 = vector.broadcast %6 : vector<1x32xf32> to vector<8x32xf32>
    %8 = arith.addf %5, %7 : vector<8x32xf32>
    %c0_9 = arith.constant 0 : index
    %c0_10 = arith.constant 0 : index
    %9 = vector.load %arg5[%c0_9, %c0_10] : memref<32x32xf32, #tpu.memory_space<vmem>>, vector<32x32xf32>
    %cst_11 = arith.constant dense<0.000000e+00> : vector<8x32xf32>
    %10 = tpu.matmul %1, %9, %cst_11 {dimension_numbers = #tpu.dot_dimension_numbers<[1], [0], [0], [1], [0, 0, 1, 1], [], []>} : vector<8x32xf32>, vector<32x32xf32>, vector<8x32xf32> -> vector<8x32xf32>
    %c0_12 = arith.constant 0 : index
    %c0_13 = arith.constant 0 : index
    %11 = vector.load %arg6[%c0_12, %c0_13] : memref<1x32xf32, #tpu.memory_space<vmem>>, vector<1x32xf32>
    %12 = vector.broadcast %11 : vector<1x32xf32> to vector<8x32xf32>
    %13 = arith.addf %10, %12 : vector<8x32xf32>
    %c0_14 = arith.constant 0 : index
    %c0_15 = arith.constant 0 : index
    %14 = vector.load %arg7[%c0_14, %c0_15] : memref<32x32xf32, #tpu.memory_space<vmem>>, vector<32x32xf32>
    %cst_16 = arith.constant dense<0.000000e+00> : vector<8x32xf32>
    %15 = tpu.matmul %1, %14, %cst_16 {dimension_numbers = #tpu.dot_dimension_numbers<[1], [0], [0], [1], [0, 0, 1, 1], [], []>} : vector<8x32xf32>, vector<32x32xf32>, vector<8x32xf32> -> vector<8x32xf32>
    %c0_17 = arith.constant 0 : index
    %c0_18 = arith.constant 0 : index
    %16 = vector.load %arg8[%c0_17, %c0_18] : memref<1x32xf32, #tpu.memory_space<vmem>>, vector<1x32xf32>
    %17 = vector.broadcast %16 : vector<1x32xf32> to vector<8x32xf32>
    %18 = arith.addf %15, %17 : vector<8x32xf32>
    %19 = vector.broadcast %3 : vector<8x1xf32> to vector<8x32xf32>
    %20 = arith.mulf %13, %19 : vector<8x32xf32>
    %21 = vector.broadcast %3 : vector<8x1xf32> to vector<8x32xf32>
    %22 = arith.mulf %18, %21 : vector<8x32xf32>
    %23 = vector.extract_strided_slice %8 {offsets = [0, 0], sizes = [8, 8], strides = [1, 1]} : vector<8x32xf32> to vector<8x8xf32>
    %24 = vector.extract_strided_slice %20 {offsets = [0, 0], sizes = [8, 8], strides = [1, 1]} : vector<8x32xf32> to vector<8x8xf32>
    %25 = vector.extract_strided_slice %22 {offsets = [0, 0], sizes = [8, 8], strides = [1, 1]} : vector<8x32xf32> to vector<8x8xf32>
    %c0_19 = arith.constant 0 : index
    %c0_20 = arith.constant 0 : index
    %c0_21 = arith.constant 0 : index
    %26 = vector.load %arg9[%c0_19, %c0_20, %c0_21] : memref<4x4x8xf32, #tpu.memory_space<vmem>>, vector<1x4x8xf32>
    %27 = vector.shape_cast %26 : vector<1x4x8xf32> to vector<4x8xf32>
    %cst_22 = arith.constant dense<0.000000e+00> : vector<4x8xf32>
    %28 = tpu.matmul %27, %24, %cst_22 {dimension_numbers = #tpu.dot_dimension_numbers<[1], [0], [0], [1], [0, 0, 1, 1], [], []>} : vector<4x8xf32>, vector<8x8xf32>, vector<4x8xf32> -> vector<4x8xf32>
    %cst_23 = arith.constant dense<0.000000e+00> : vector<4x8xf32>
    %29 = tpu.matmul %27, %25, %cst_23 {dimension_numbers = #tpu.dot_dimension_numbers<[1], [0], [0], [1], [0, 0, 1, 1], [], []>} : vector<4x8xf32>, vector<8x8xf32>, vector<4x8xf32> -> vector<4x8xf32>
    %30 = tpu.transpose %28, [1, 0] : vector<4x8xf32> -> vector<8x4xf32>
    %cst_24 = arith.constant dense<0.000000e+00> : vector<8x4xf32>
    %31 = tpu.matmul %23, %30, %cst_24 {dimension_numbers = #tpu.dot_dimension_numbers<[1], [0], [0], [1], [0, 0, 1, 1], [], []>} : vector<8x8xf32>, vector<8x4xf32>, vector<8x4xf32> -> vector<8x4xf32>
    %cst_25 = arith.constant 0.353553385 : f32
    %32 = vector.broadcast %cst_25 : f32 to vector<8x4xf32>
    %33 = arith.mulf %31, %32 : vector<8x4xf32>
    %cst_26 = arith.constant dense<0xFF800000> : vector<8xf32>
    %34 = vector.multi_reduction <maximumf>, %33, %cst_26 [1] : vector<8x4xf32> to vector<8xf32>
    %35 = vector.shape_cast %34 : vector<8xf32> to vector<8x1xf32>
    %36 = vector.broadcast %35 : vector<8x1xf32> to vector<8x4xf32>
    %37 = arith.subf %33, %36 : vector<8x4xf32>
    %38 = math.exp %37 : vector<8x4xf32>
    %cst_27 = arith.constant dense<0.000000e+00> : vector<8xf32>
    %39 = vector.multi_reduction <add>, %38, %cst_27 [1] : vector<8x4xf32> to vector<8xf32>
    %40 = vector.shape_cast %39 : vector<8xf32> to vector<8x1xf32>
    %41 = tpu.reciprocal %40 {approx = true} : vector<8x1xf32> -> vector<8x1xf32>
    %42 = vector.broadcast %41 : vector<8x1xf32> to vector<8x4xf32>
    %43 = arith.mulf %38, %42 : vector<8x4xf32>
    %cst_28 = arith.constant dense<0.000000e+00> : vector<8x8xf32>
    %44 = tpu.matmul %43, %29, %cst_28 {dimension_numbers = #tpu.dot_dimension_numbers<[1], [0], [0], [1], [0, 0, 1, 1], [], []>} : vector<8x4xf32>, vector<4x8xf32>, vector<8x8xf32> -> vector<8x8xf32>
    %45 = vector.extract_strided_slice %8 {offsets = [0, 8], sizes = [8, 8], strides = [1, 1]} : vector<8x32xf32> to vector<8x8xf32>
    %46 = vector.extract_strided_slice %20 {offsets = [0, 8], sizes = [8, 8], strides = [1, 1]} : vector<8x32xf32> to vector<8x8xf32>
    %47 = vector.extract_strided_slice %22 {offsets = [0, 8], sizes = [8, 8], strides = [1, 1]} : vector<8x32xf32> to vector<8x8xf32>
    %c1 = arith.constant 1 : index
    %c0_29 = arith.constant 0 : index
    %c0_30 = arith.constant 0 : index
    %48 = vector.load %arg9[%c1, %c0_29, %c0_30] : memref<4x4x8xf32, #tpu.memory_space<vmem>>, vector<1x4x8xf32>
    %49 = vector.shape_cast %48 : vector<1x4x8xf32> to vector<4x8xf32>
    %cst_31 = arith.constant dense<0.000000e+00> : vector<4x8xf32>
    %50 = tpu.matmul %49, %46, %cst_31 {dimension_numbers = #tpu.dot_dimension_numbers<[1], [0], [0], [1], [0, 0, 1, 1], [], []>} : vector<4x8xf32>, vector<8x8xf32>, vector<4x8xf32> -> vector<4x8xf32>
    %cst_32 = arith.constant dense<0.000000e+00> : vector<4x8xf32>
    %51 = tpu.matmul %49, %47, %cst_32 {dimension_numbers = #tpu.dot_dimension_numbers<[1], [0], [0], [1], [0, 0, 1, 1], [], []>} : vector<4x8xf32>, vector<8x8xf32>, vector<4x8xf32> -> vector<4x8xf32>
    %52 = tpu.transpose %50, [1, 0] : vector<4x8xf32> -> vector<8x4xf32>
    %cst_33 = arith.constant dense<0.000000e+00> : vector<8x4xf32>
    %53 = tpu.matmul %45, %52, %cst_33 {dimension_numbers = #tpu.dot_dimension_numbers<[1], [0], [0], [1], [0, 0, 1, 1], [], []>} : vector<8x8xf32>, vector<8x4xf32>, vector<8x4xf32> -> vector<8x4xf32>
    %cst_34 = arith.constant 0.353553385 : f32
    %54 = vector.broadcast %cst_34 : f32 to vector<8x4xf32>
    %55 = arith.mulf %53, %54 : vector<8x4xf32>
    %cst_35 = arith.constant dense<0xFF800000> : vector<8xf32>
    %56 = vector.multi_reduction <maximumf>, %55, %cst_35 [1] : vector<8x4xf32> to vector<8xf32>
    %57 = vector.shape_cast %56 : vector<8xf32> to vector<8x1xf32>
    %58 = vector.broadcast %57 : vector<8x1xf32> to vector<8x4xf32>
    %59 = arith.subf %55, %58 : vector<8x4xf32>
    %60 = math.exp %59 : vector<8x4xf32>
    %cst_36 = arith.constant dense<0.000000e+00> : vector<8xf32>
    %61 = vector.multi_reduction <add>, %60, %cst_36 [1] : vector<8x4xf32> to vector<8xf32>
    %62 = vector.shape_cast %61 : vector<8xf32> to vector<8x1xf32>
    %63 = tpu.reciprocal %62 {approx = true} : vector<8x1xf32> -> vector<8x1xf32>
    %64 = vector.broadcast %63 : vector<8x1xf32> to vector<8x4xf32>
    %65 = arith.mulf %60, %64 : vector<8x4xf32>
    %cst_37 = arith.constant dense<0.000000e+00> : vector<8x8xf32>
    %66 = tpu.matmul %65, %51, %cst_37 {dimension_numbers = #tpu.dot_dimension_numbers<[1], [0], [0], [1], [0, 0, 1, 1], [], []>} : vector<8x4xf32>, vector<4x8xf32>, vector<8x8xf32> -> vector<8x8xf32>
    %67 = vector.extract_strided_slice %8 {offsets = [0, 16], sizes = [8, 8], strides = [1, 1]} : vector<8x32xf32> to vector<8x8xf32>
    %68 = vector.extract_strided_slice %20 {offsets = [0, 16], sizes = [8, 8], strides = [1, 1]} : vector<8x32xf32> to vector<8x8xf32>
    %69 = vector.extract_strided_slice %22 {offsets = [0, 16], sizes = [8, 8], strides = [1, 1]} : vector<8x32xf32> to vector<8x8xf32>
    %c2 = arith.constant 2 : index
    %c0_38 = arith.constant 0 : index
    %c0_39 = arith.constant 0 : index
    %70 = vector.load %arg9[%c2, %c0_38, %c0_39] : memref<4x4x8xf32, #tpu.memory_space<vmem>>, vector<1x4x8xf32>
    %71 = vector.shape_cast %70 : vector<1x4x8xf32> to vector<4x8xf32>
    %cst_40 = arith.constant dense<0.000000e+00> : vector<4x8xf32>
    %72 = tpu.matmul %71, %68, %cst_40 {dimension_numbers = #tpu.dot_dimension_numbers<[1], [0], [0], [1], [0, 0, 1, 1], [], []>} : vector<4x8xf32>, vector<8x8xf32>, vector<4x8xf32> -> vector<4x8xf32>
    %cst_41 = arith.constant dense<0.000000e+00> : vector<4x8xf32>
    %73 = tpu.matmul %71, %69, %cst_41 {dimension_numbers = #tpu.dot_dimension_numbers<[1], [0], [0], [1], [0, 0, 1, 1], [], []>} : vector<4x8xf32>, vector<8x8xf32>, vector<4x8xf32> -> vector<4x8xf32>
    %74 = tpu.transpose %72, [1, 0] : vector<4x8xf32> -> vector<8x4xf32>
    %cst_42 = arith.constant dense<0.000000e+00> : vector<8x4xf32>
    %75 = tpu.matmul %67, %74, %cst_42 {dimension_numbers = #tpu.dot_dimension_numbers<[1], [0], [0], [1], [0, 0, 1, 1], [], []>} : vector<8x8xf32>, vector<8x4xf32>, vector<8x4xf32> -> vector<8x4xf32>
    %cst_43 = arith.constant 0.353553385 : f32
    %76 = vector.broadcast %cst_43 : f32 to vector<8x4xf32>
    %77 = arith.mulf %75, %76 : vector<8x4xf32>
    %cst_44 = arith.constant dense<0xFF800000> : vector<8xf32>
    %78 = vector.multi_reduction <maximumf>, %77, %cst_44 [1] : vector<8x4xf32> to vector<8xf32>
    %79 = vector.shape_cast %78 : vector<8xf32> to vector<8x1xf32>
    %80 = vector.broadcast %79 : vector<8x1xf32> to vector<8x4xf32>
    %81 = arith.subf %77, %80 : vector<8x4xf32>
    %82 = math.exp %81 : vector<8x4xf32>
    %cst_45 = arith.constant dense<0.000000e+00> : vector<8xf32>
    %83 = vector.multi_reduction <add>, %82, %cst_45 [1] : vector<8x4xf32> to vector<8xf32>
    %84 = vector.shape_cast %83 : vector<8xf32> to vector<8x1xf32>
    %85 = tpu.reciprocal %84 {approx = true} : vector<8x1xf32> -> vector<8x1xf32>
    %86 = vector.broadcast %85 : vector<8x1xf32> to vector<8x4xf32>
    %87 = arith.mulf %82, %86 : vector<8x4xf32>
    %cst_46 = arith.constant dense<0.000000e+00> : vector<8x8xf32>
    %88 = tpu.matmul %87, %73, %cst_46 {dimension_numbers = #tpu.dot_dimension_numbers<[1], [0], [0], [1], [0, 0, 1, 1], [], []>} : vector<8x4xf32>, vector<4x8xf32>, vector<8x8xf32> -> vector<8x8xf32>
    %89 = vector.extract_strided_slice %8 {offsets = [0, 24], sizes = [8, 8], strides = [1, 1]} : vector<8x32xf32> to vector<8x8xf32>
    %90 = vector.extract_strided_slice %20 {offsets = [0, 24], sizes = [8, 8], strides = [1, 1]} : vector<8x32xf32> to vector<8x8xf32>
    %91 = vector.extract_strided_slice %22 {offsets = [0, 24], sizes = [8, 8], strides = [1, 1]} : vector<8x32xf32> to vector<8x8xf32>
    %c3 = arith.constant 3 : index
    %c0_47 = arith.constant 0 : index
    %c0_48 = arith.constant 0 : index
    %92 = vector.load %arg9[%c3, %c0_47, %c0_48] : memref<4x4x8xf32, #tpu.memory_space<vmem>>, vector<1x4x8xf32>
    %93 = vector.shape_cast %92 : vector<1x4x8xf32> to vector<4x8xf32>
    %cst_49 = arith.constant dense<0.000000e+00> : vector<4x8xf32>
    %94 = tpu.matmul %93, %90, %cst_49 {dimension_numbers = #tpu.dot_dimension_numbers<[1], [0], [0], [1], [0, 0, 1, 1], [], []>} : vector<4x8xf32>, vector<8x8xf32>, vector<4x8xf32> -> vector<4x8xf32>
    %cst_50 = arith.constant dense<0.000000e+00> : vector<4x8xf32>
    %95 = tpu.matmul %93, %91, %cst_50 {dimension_numbers = #tpu.dot_dimension_numbers<[1], [0], [0], [1], [0, 0, 1, 1], [], []>} : vector<4x8xf32>, vector<8x8xf32>, vector<4x8xf32> -> vector<4x8xf32>
    %96 = tpu.transpose %94, [1, 0] : vector<4x8xf32> -> vector<8x4xf32>
    %cst_51 = arith.constant dense<0.000000e+00> : vector<8x4xf32>
    %97 = tpu.matmul %89, %96, %cst_51 {dimension_numbers = #tpu.dot_dimension_numbers<[1], [0], [0], [1], [0, 0, 1, 1], [], []>} : vector<8x8xf32>, vector<8x4xf32>, vector<8x4xf32> -> vector<8x4xf32>
    %cst_52 = arith.constant 0.353553385 : f32
    %98 = vector.broadcast %cst_52 : f32 to vector<8x4xf32>
    %99 = arith.mulf %97, %98 : vector<8x4xf32>
    %cst_53 = arith.constant dense<0xFF800000> : vector<8xf32>
    %100 = vector.multi_reduction <maximumf>, %99, %cst_53 [1] : vector<8x4xf32> to vector<8xf32>
    %101 = vector.shape_cast %100 : vector<8xf32> to vector<8x1xf32>
    %102 = vector.broadcast %101 : vector<8x1xf32> to vector<8x4xf32>
    %103 = arith.subf %99, %102 : vector<8x4xf32>
    %104 = math.exp %103 : vector<8x4xf32>
    %cst_54 = arith.constant dense<0.000000e+00> : vector<8xf32>
    %105 = vector.multi_reduction <add>, %104, %cst_54 [1] : vector<8x4xf32> to vector<8xf32>
    %106 = vector.shape_cast %105 : vector<8xf32> to vector<8x1xf32>
    %107 = tpu.reciprocal %106 {approx = true} : vector<8x1xf32> -> vector<8x1xf32>
    %108 = vector.broadcast %107 : vector<8x1xf32> to vector<8x4xf32>
    %109 = arith.mulf %104, %108 : vector<8x4xf32>
    %cst_55 = arith.constant dense<0.000000e+00> : vector<8x8xf32>
    %110 = tpu.matmul %109, %95, %cst_55 {dimension_numbers = #tpu.dot_dimension_numbers<[1], [0], [0], [1], [0, 0, 1, 1], [], []>} : vector<8x4xf32>, vector<4x8xf32>, vector<8x8xf32> -> vector<8x8xf32>
    %111 = tpu.concatenate %44, %66, %88, %110 in 1 : vector<8x8xf32>, vector<8x8xf32>, vector<8x8xf32>, vector<8x8xf32> -> vector<8x32xf32>
    %c0_56 = arith.constant 0 : index
    %c0_57 = arith.constant 0 : index
    %112 = vector.load %arg10[%c0_56, %c0_57] : memref<32x32xf32, #tpu.memory_space<vmem>>, vector<32x32xf32>
    %cst_58 = arith.constant dense<0.000000e+00> : vector<8x32xf32>
    %113 = tpu.matmul %111, %112, %cst_58 {dimension_numbers = #tpu.dot_dimension_numbers<[1], [0], [0], [1], [0, 0, 1, 1], [], []>} : vector<8x32xf32>, vector<32x32xf32>, vector<8x32xf32> -> vector<8x32xf32>
    %c0_59 = arith.constant 0 : index
    %c0_60 = arith.constant 0 : index
    %114 = vector.load %arg11[%c0_59, %c0_60] : memref<1x32xf32, #tpu.memory_space<vmem>>, vector<1x32xf32>
    %115 = vector.broadcast %114 : vector<1x32xf32> to vector<8x32xf32>
    %116 = arith.addf %113, %115 : vector<8x32xf32>
    %c0_61 = arith.constant 0 : index
    %c0_62 = arith.constant 0 : index
    %c0_63 = arith.constant 0 : index
    %117 = vector.load %arg12[%c0_61, %c0_62, %c0_63] : memref<1x8x32xf32, #tpu.memory_space<vmem>>, vector<1x8x32xf32>
    %118 = vector.shape_cast %117 : vector<1x8x32xf32> to vector<8x32xf32>
    %119 = vector.shape_cast %116 : vector<8x32xf32> to vector<1x8x32xf32>
    tpu.vector_store %arg12[%c0_61, %c0_62, %c0_63], %119 {strides = array<i32>} : memref<1x8x32xf32, #tpu.memory_space<vmem>>, vector<1x8x32xf32>,
    return
  }
  func.func @transform_0(%arg0: i32) -> (i32, i32, i32) {
    %c0_i32 = arith.constant 0 : i32
    %c0_i32_0 = arith.constant 0 : i32
    %c0_i32_1 = arith.constant 0 : i32
    return %arg0, %c0_i32, %c0_i32_0 : i32, i32, i32
  }
  func.func @transform_1(%arg0: i32) -> (i32, i32, i32) {
    %c0_i32 = arith.constant 0 : i32
    %c0_i32_0 = arith.constant 0 : i32
    %c0_i32_1 = arith.constant 0 : i32
    return %arg0, %c0_i32, %c0_i32_0 : i32, i32, i32
  }
  func.func @transform_2(%arg0: i32) -> (i32, i32) {
    %c0_i32 = arith.constant 0 : i32
    %c0_i32_0 = arith.constant 0 : i32
    %c0_i32_1 = arith.constant 0 : i32
    return %c0_i32, %c0_i32_0 : i32, i32
  }
  func.func @transform_3(%arg0: i32) -> (i32, i32) {
    %c0_i32 = arith.constant 0 : i32
    %c0_i32_0 = arith.constant 0 : i32
    %c0_i32_1 = arith.constant 0 : i32
    return %c0_i32, %c0_i32_0 : i32, i32
  }
  func.func @transform_4(%arg0: i32) -> (i32, i32) {
    %c0_i32 = arith.constant 0 : i32
    %c0_i32_0 = arith.constant 0 : i32
    %c0_i32_1 = arith.constant 0 : i32
    return %c0_i32, %c0_i32_0 : i32, i32
  }
  func.func @transform_5(%arg0: i32) -> (i32, i32) {
    %c0_i32 = arith.constant 0 : i32
    %c0_i32_0 = arith.constant 0 : i32
    %c0_i32_1 = arith.constant 0 : i32
    return %c0_i32, %c0_i32_0 : i32, i32
  }
  func.func @transform_6(%arg0: i32) -> (i32, i32) {
    %c0_i32 = arith.constant 0 : i32
    %c0_i32_0 = arith.constant 0 : i32
    %c0_i32_1 = arith.constant 0 : i32
    return %c0_i32, %c0_i32_0 : i32, i32
  }
  func.func @transform_7(%arg0: i32) -> (i32, i32) {
    %c0_i32 = arith.constant 0 : i32
    %c0_i32_0 = arith.constant 0 : i32
    %c0_i32_1 = arith.constant 0 : i32
    return %c0_i32, %c0_i32_0 : i32, i32
  }
  func.func @transform_8(%arg0: i32) -> (i32, i32, i32) {
    %c0_i32 = arith.constant 0 : i32
    %c0_i32_0 = arith.constant 0 : i32
    %c0_i32_1 = arith.constant 0 : i32
    %c0_i32_2 = arith.constant 0 : i32
    return %c0_i32, %c0_i32_0, %c0_i32_1 : i32, i32, i32
  }
  func.func @transform_9(%arg0: i32) -> (i32, i32) {
    %c0_i32 = arith.constant 0 : i32
    %c0_i32_0 = arith.constant 0 : i32
    %c0_i32_1 = arith.constant 0 : i32
    return %c0_i32, %c0_i32_0 : i32, i32
  }
  func.func @transform_10(%arg0: i32) -> (i32, i32) {
    %c0_i32 = arith.constant 0 : i32
    %c0_i32_0 = arith.constant 0 : i32
    %c0_i32_1 = arith.constant 0 : i32
    return %c0_i32, %c0_i32_0 : i32, i32
  }
  func.func @transform_11(%arg0: i32) -> (i32, i32, i32) {
    %c0_i32 = arith.constant 0 : i32
    %c0_i32_0 = arith.constant 0 : i32
    %c0_i32_1 = arith.constant 0 : i32
    return %arg0, %c0_i32, %c0_i32_0 : i32, i32, i32
  }
}

</mosaic_0001>

<bundles_post_ra>
// kernel: tpu_custom_call.1
= control target key start
LH: loop header
LB: loop body
LE: loop exit
PB: predicated region body
PF: predicated region fallthrough
CT: control target
= control target key end

     0   :  { %s3534_s0 = inlined_call_operand.hbm [shape: f32[2,8,32], index: 0, kind: input, shape index: {}]   ;;  %s3535_s1 = inlined_call_operand.vmem [shape: f32[2,8,1], index: 1, kind: input, shape index: {}]   ;;  %s3536_s2 = inlined_call_operand.hbm [shape: f32[32,32], index: 2, kind: input, shape index: {}]   ;;  %s3537_s3 = inlined_call_operand.hbm [shape: f32[1,32], index: 3, kind: input, shape index: {}]   ;;  %s3538_s4 = inlined_call_operand.vmem [shape: f32[32,32], index: 4, kind: input, shape index: {}]   ;;  %s3539_s5 = inlined_call_operand.hbm [shape: f32[1,32], index: 5, kind: input, shape index: {}]   ;;  %s3540_s6 = inlined_call_operand.hbm [shape: f32[32,32], index: 6, kind: input, shape index: {}]   ;;  %s3541_s7 = inlined_call_operand.hbm [shape: f32[1,32], index: 7, kind: input, shape index: {}]   ;;  %s3542_s8 = inlined_call_operand.vmem [shape: f32[4,4,8], index: 8, kind: input, shape index: {}]   ;;  %s3543_s9 = inlined_call_operand.hbm [shape: f32[32,32], index: 9, kind: input, shape index: {}]   ;;  %s3544_s10 = inlined_call_operand.vmem [shape: f32[1,32], index: 10, kind: input, shape index: {}]   ;;  %s3545_s11 = inlined_call_operand.hbm [shape: f32[2,8,32], index: 11, kind: output, shape index: {}]  }
   0x1   :  { %3553 = sst [smem:[#allocation20_spill]] %s3536_s2 }
   0x2   :  { %3554 = sst [smem:[#allocation21_spill]] %s3542_s8 }
   0x3   :  { %3555 = sst [smem:[#allocation22_spill]] %s3544_s10 }
   0x4   :  { %3556 = sst [smem:[#allocation23_spill]] %s3545_s11 }
   0x5   :  { %16 = vsyncpa [#allocation3], 0 }
   0x6   :  { %18 = vsyncpa [#allocation3 + $0x1], 0 }
   0x7   :  { %19 = vsyncpa [#allocation6], 0 }
   0x8   :  { %20 = vsyncpa [#allocation9], 0 }
   0x9   :  { %21 = vsyncpa [#allocation12], 0 }
   0xa   :  { %22 = vsyncpa [#allocation4], 0 }
   0xb   :  { %24 = vsyncpa [#allocation4 + $0x1], 0  ;;  %s3026_s17 = smov 0   ;;  %s3028_s18 = smov 0  }
   0xc   :  { %s3030_s19 = smov 0   ;;  %s3032_s20 = smov 0  }
   0xd LB: > { %s2946_s21 = smov [#allocation5]   ;;  %s3047_s23 = sadd.s32 4294967295, %s2944_s20   ;;  %s2944_s20 = sphi %s3032_s20, %s3584_s20   ;;  %s2940_s19 = sphi %s3030_s19, %s3583_s19   ;;  %s2936_s18 = sphi %s3028_s18, %s3582_s18   ;;  %s2932_s17 = sphi %s3026_s17, %s3581_s17  }
   0xe   : > { %s314_s22 = sshll.u32 %s2946_s21, 4  ;;  %p2273_p0 = scmp.ge.s32.totalorder %s2944_s20, 1  ;;  %s3052_s22 = int_to_ptr.vmem [resolvable:$true] %s314_s22 }
   0xf   : > { %p3550_p1 = scmp.eq.s32.totalorder %s3047_s23, 0  ;;  %p302_p2 = scmp.lt.s32.totalorder %s2944_s20, 3 }
  0x10   : > { %s2947_s25 = smov [#allocation8]   ;;  %s2948_s28 = smov [#allocation11]  }
  0x11   : > { %p3054_p3 = pnand %p2273_p0, %p302_p2  ;;  %s342_s26 = sshll.u32 %s2947_s25, 4  ;;  %s3067_s26 = int_to_ptr.vmem [resolvable:$true] %s342_s26 }
  0x12   : > { %s366_s29 = sshll.u32 %s2948_s28, 4  ;;  %s3559_s2 = sld [smem:[#allocation20_spill]]  ;;  %s3069_s29 = int_to_ptr.vmem [resolvable:$true] %s366_s29 }
  0x13   : > { %s3557_s24 = scalar_select %p3054_p3, 1, 0 }
  0x14   : > { %p2560_p5 = pneg %p3054_p3 }
  0x16   : > { %p3063_p6 = pnand %p2560_p5, %p3550_p1 }
  0x18   : > { %s2668_s13 = scalar_lea.hbm %s3559_s2, 512  ;;  %p3079_p8 = pneg %p3063_p6 }
  0x19   : > { %p2669_p7 = scmp.ne.s32.totalorder %s3559_s2, %s2668_s13  ;;  %p2675_p11 = scmp.lt.u32.totalorder %s2668_s13, %s3559_s2 }
  0x1b   : > { %p2671_p9 = pnand %p3079_p8, %p2669_p7 }
  0x1d   : > { %p2672_p10 = pneg %p2671_p9 }
  0x1f   : > { %p2677_p12 = pnand %p2675_p11, %p2672_p10 }
  0x21   : > { %2680 = shalt.err (!%p2677_p12)
}
  0x22   : > { %s2681_s28 = scalar_lea.vmem %s3052_s22, 512  ;;  %p2689_p5 = scmp.lt.s32.totalorder %s3052_s22, %s3052_s22 }
  0x23   : > { %p2682_p13 = scmp.ne.s32.totalorder %s3052_s22, %s2681_s28  ;;  %p2690_p4 = scmp.lt.s32.totalorder %s2681_s28, %s2681_s28 }
  0x25   : > { %p2684_p0 = pnand %p2682_p13, %p3079_p8  ;;  %p2691_p7 = por %p2690_p4, %p2689_p5 }
  0x27   : > { %p2685_p2 = pneg %p2684_p0 }
  0x29   : > { %p2692_p9 = pnand %p2691_p7, %p2685_p2 }
  0x2b   : > { %2695 = shalt.err (!%p2692_p9)
}
  0x2c   : > { %s3548_s30 = smov 128   ;;  %s2950_s12 = smov 8  }
  0x2d   : > { %2563 = dma.hbm_to_vmem [thread:$0]  (!%p3063_p6), %s3559_s2, 512, %s3052_s22, [#allocation6], %s3548_s30, %s3548_s30, %s2950_s12  }
  0x2e   : > { %s2696_s25 = scalar_lea.hbm %s3539_s5, 16 }
  0x2f   : > { %p2697_p4 = scmp.ne.s32.totalorder %s3539_s5, %s2696_s25  ;;  %p2703_p12 = scmp.lt.u32.totalorder %s2696_s25, %s3539_s5 }
  0x31   : > { %p2699_p10 = pnand %p2697_p4, %p3079_p8 }
  0x33   : > { %p2700_p11 = pneg %p2699_p10 }
  0x35   : > { %p2705_p13 = pnand %p2703_p12, %p2700_p11 }
  0x37   : > { %2708 = shalt.err (!%p2705_p13)
}
  0x38   : > { %s2709_s22 = scalar_lea.vmem %s3067_s26, 16  ;;  %s2716_s11 = scalar_lea.vmem %s3067_s26, 32 }
  0x39   : > { %p2710_p0 = scmp.ne.s32.totalorder %s3067_s26, %s2709_s22  ;;  %p2717_p7 = scmp.lt.s32.totalorder %s3067_s26, %s3067_s26 }
  0x3a   : > { %p2718_p9 = scmp.lt.s32.totalorder %s2716_s11, %s2709_s22 }
  0x3b   : > { %p2712_p2 = pnand %p2710_p0, %p3079_p8 }
  0x3c   : > { %p2719_p4 = por %p2718_p9, %p2717_p7 }
  0x3d   : > { %p2713_p5 = pneg %p2712_p2 }
  0x3f   : > { %p2720_p10 = pnand %p2719_p4, %p2713_p5 }
  0x41   : > { %2723 = shalt.err (!%p2720_p10)
}
  0x42   : > { %2569 = dma.hbm_to_vmem [thread:$0]  (!%p3063_p6), %s3539_s5, 16, %s3067_s26, [#allocation9]  }
  0x43   : > { %s2724_s15 = scalar_lea.hbm %s3541_s7, 16 }
  0x44   : > { %p2725_p11 = scmp.ne.s32.totalorder %s3541_s7, %s2724_s15  ;;  %p2731_p0 = scmp.lt.u32.totalorder %s2724_s15, %s3541_s7 }
  0x46   : > { %p2727_p12 = pnand %p2725_p11, %p3079_p8 }
  0x48   : > { %p2728_p13 = pneg %p2727_p12 }
  0x4a   : > { %p2733_p2 = pnand %p2731_p0, %p2728_p13 }
  0x4c   : > { %2736 = shalt.err (!%p2733_p2)
}
  0x4d   : > { %s2737_s26 = scalar_lea.vmem %s3069_s29, 16  ;;  %s2744_s11 = scalar_lea.vmem %s3069_s29, 32 }
  0x4e   : > { %p2738_p5 = scmp.ne.s32.totalorder %s3069_s29, %s2737_s26  ;;  %p2745_p4 = scmp.lt.s32.totalorder %s3069_s29, %s3069_s29 }
  0x4f   : > { %p2746_p10 = scmp.lt.s32.totalorder %s2744_s11, %s2737_s26 }
  0x50   : > { %p2740_p7 = pnand %p2738_p5, %p3079_p8 }
  0x51   : > { %p2747_p11 = por %p2746_p10, %p2745_p4 }
  0x52   : > { %p2741_p9 = pneg %p2740_p7 }
  0x54   : > { %p2748_p12 = pnand %p2747_p11, %p2741_p9 }
  0x56   : > { %2751 = shalt.err (!%p2748_p12)
}
  0x57   : > { %2575 = dma.hbm_to_vmem [thread:$0]  (!%p3063_p6), %s3541_s7, 16, %s3069_s29, [#allocation12]  }
  0x58   : > { %s2951_s13 = smov [#allocation7]   ;;  %s2952_s15 = smov [#allocation10]  }
  0x59   : > { %s328_s14 = sshll.u32 %s2951_s13, 4  ;;  %s352_s21 = sshll.u32 %s2952_s15, 4  ;;  %s329_s14 = int_to_ptr.vmem [resolvable:$true] %s328_s14  ;;  %s353_s21 = int_to_ptr.vmem [resolvable:$true] %s352_s21 }
  0x5a   : > { %s2752_s22 = scalar_lea.hbm %s3537_s3, 16 }
  0x5b   : > { %p2753_p13 = scmp.ne.s32.totalorder %s3537_s3, %s2752_s22  ;;  %p2759_p5 = scmp.lt.u32.totalorder %s2752_s22, %s3537_s3 }
  0x5d   : > { %p2755_p0 = pnand %p2753_p13, %p3079_p8 }
  0x5f   : > { %p2756_p2 = pneg %p2755_p0 }
  0x61   : > { %p2761_p7 = pnand %p2759_p5, %p2756_p2 }
  0x63   : > { %2764 = shalt.err (!%p2761_p7)
}
  0x64   : > { %s2765_s29 = scalar_lea.vmem %s329_s14, 16  ;;  %s2772_s10 = scalar_lea.vmem %s329_s14, 32 }
  0x65   : > { %p2766_p9 = scmp.ne.s32.totalorder %s329_s14, %s2765_s29  ;;  %p2773_p11 = scmp.lt.s32.totalorder %s329_s14, %s329_s14 }
  0x66   : > { %p2774_p12 = scmp.lt.s32.totalorder %s2772_s10, %s2765_s29 }
  0x67   : > { %p2768_p4 = pnand %p2766_p9, %p3079_p8 }
  0x68   : > { %p2775_p1 = por %p2774_p12, %p2773_p11 }
  0x69   : > { %p2769_p10 = pneg %p2768_p4 }
  0x6b   : > { %p2776_p3 = pnand %p2775_p1, %p2769_p10 }
  0x6d   : > { %2779 = shalt.err (!%p2776_p3)
}
  0x6e   : > { %2566 = dma.hbm_to_vmem [thread:$0]  (!%p3063_p6), %s3537_s3, 16, %s329_s14, [#allocation6]  }
  0x6f   : > { %s2780_s28 = scalar_lea.hbm %s3540_s6, 512 }
  0x70   : > { %p2781_p13 = scmp.ne.s32.totalorder %s3540_s6, %s2780_s28  ;;  %p2787_p3 = scmp.lt.u32.totalorder %s2780_s28, %s3540_s6 }
  0x72   : > { %p2783_p0 = pnand %p2781_p13, %p3079_p8 }
  0x74   : > { %p2784_p1 = pneg %p2783_p0 }
  0x76   : > { %p2789_p2 = pnand %p2787_p3, %p2784_p1 }
  0x78   : > { %2792 = shalt.err (!%p2789_p2)
}
  0x79   : > { %s2793_s29 = scalar_lea.vmem %s353_s21, 512  ;;  %p2801_p4 = scmp.lt.s32.totalorder %s353_s21, %s353_s21 }
  0x7a   : > { %p2794_p5 = scmp.ne.s32.totalorder %s353_s21, %s2793_s29  ;;  %p2802_p10 = scmp.lt.s32.totalorder %s2793_s29, %s2793_s29 }
  0x7c   : > { %p2796_p7 = pnand %p2794_p5, %p3079_p8  ;;  %p2803_p11 = por %p2802_p10, %p2801_p4 }
  0x7e   : > { %p2797_p9 = pneg %p2796_p7 }
  0x80   : > { %p2804_p12 = pnand %p2803_p11, %p2797_p9 }
  0x82   : > { %2807 = shalt.err (!%p2804_p12)
}
  0x83   : > { %s3561_s14 = smov 128   ;;  %s2953_s15 = smov [#allocation13]  }
  0x84   : > { %2572 = dma.hbm_to_vmem [thread:$0]  (!%p3063_p6), %s3540_s6, 512, %s353_s21, [#allocation9], %s3561_s14, %s3561_s14, %s2950_s12  }
  0x85   : > { %s379_s30 = sshll.u32 %s2953_s15, 4  ;;  %s2808_s22 = scalar_lea.hbm %s3543_s9, 512  ;;  %s380_s30 = int_to_ptr.vmem [resolvable:$true] %s379_s30 }
  0x86   : > { %p2809_p13 = scmp.ne.s32.totalorder %s3543_s9, %s2808_s22  ;;  %p2815_p3 = scmp.lt.u32.totalorder %s2808_s22, %s3543_s9 }
  0x88   : > { %p2811_p0 = pnand %p2809_p13, %p3079_p8 }
  0x8a   : > { %p2812_p1 = pneg %p2811_p0 }
  0x8c   : > { %p2817_p2 = pnand %p2815_p3, %p2812_p1 }
  0x8e   : > { %2820 = shalt.err (!%p2817_p2)
}
  0x8f   : > { %s2821_s21 = scalar_lea.vmem %s380_s30, 512  ;;  %p2829_p4 = scmp.lt.s32.totalorder %s380_s30, %s380_s30 }
  0x90   : > { %p2822_p5 = scmp.ne.s32.totalorder %s380_s30, %s2821_s21  ;;  %p2830_p10 = scmp.lt.s32.totalorder %s2821_s21, %s2821_s21 }
  0x92   : > { %p2824_p7 = pnand %p2822_p5, %p3079_p8  ;;  %p2831_p11 = por %p2830_p10, %p2829_p4 }
  0x94   : > { %p2825_p9 = pneg %p2824_p7 }
  0x96   : > { %p2832_p12 = pnand %p2831_p11, %p2825_p9 }
  0x98   : > { %2835 = shalt.err (!%p2832_p12)
}
  0x99   : > { %2578 = dma.hbm_to_vmem [thread:$0]  (!%p3063_p6), %s3543_s9, 512, %s380_s30, [#allocation12], %s3561_s14, %s3561_s14, %s2950_s12  }
  0x9a   : > { %s2272_s27 = sadd.s32 4294967294, %s2944_s20   ;;  %s3213_s16 = sadd.s32 1, %s2944_s20  }
  0x9b   : > { %s34_s15 = ssub.s32 %s2944_s20, %s3213_s16  ;;  %s37_s25 = sadd.s32 1, %s2940_s19 }
  0x9c   : > { %p35_p8 = scmp.eq.s32.totalorder %s34_s15, 0  ;;  %p44_p13 = scmp.ne.s32.totalorder %s2940_s19, %s2936_s18 }
  0x9d   : > { %p45_p0 = scmp.eq.s32.totalorder %s2944_s20, 0  ;;  %p50_p1 = scmp.ne.s32.totalorder %s2936_s18, %s2932_s17 }
  0x9e   : > { %s3224_s28 = scalar_select %p35_p8, %s2940_s19, %s37_s25  }
  0x9f   : > { %p3226_p3 = por %p45_p0, %p44_p13  ;;  %p3563_p2 = scmp.eq.s32.totalorder %s3047_s23, 0 }
  0xa0   : > { %p289_p5 = scmp.eq.s32.totalorder %s3047_s23, 1  ;;  %p295_p7 = scmp.eq.s32.totalorder %s2272_s27, 1 }
  0xa1   : > { %p3232_p6 = por %p3563_p2, %p50_p1  ;;  %p2593_p9 = scmp.lt.s32.totalorder %s2944_s20, 2 }
  0xa2   : > { %s396_s14 = sand.u32 1, %s2940_s19   ;;  %p3239_p4 = por %p289_p5, %p44_p13 }
  0xa3   : > { %p3243_p10 = por %p295_p7, %p50_p1  ;;  %s2281_s11 = sshll.u32 %s396_s14, 3 }
  0xa4   : > { %s3565_s30 = scalar_select %p3239_p4, 1, 0 }
  0xa5   : > { %s3566_s26 = scalar_select %p3243_p10, 1, 0 }
  0xa6   : > { %s2282_s8 = sshll.u32 %s2944_s20, 7  ;;  %s400_s13 = scalar_lea.vmem [#allocation2], %s2281_s11 }
  0xa7   : > { %s3251_s10 = scalar_lea.hbm %s3534_s0, %s2282_s8  ;;  %s407_s27 = sshll.u32 %s400_s13, 4  ;;  %s3253_s27 = int_to_ptr.vmem [resolvable:$true] %s407_s27 }
  0xa8   : > { %p3257_p11 = pnand %p2593_p9, %p3226_p3  ;;  %s397_s25 = scalar_lea.sflag [#allocation3], %s396_s14 }
  0xa9   : > { %s2836_s2 = scalar_lea.hbm %s3251_s10, 128  ;;  %s2841_s29 = scalar_lea.hbm %s3534_s0, 256 }
  0xaa   : > { %p2837_p12 = scmp.ne.s32.totalorder %s3251_s10, %s2836_s2  ;;  %p2838_p8 = pneg %p3257_p11 }
  0xab   : > { %p2842_p1 = scmp.lt.u32.totalorder %s3251_s10, %s3534_s0  ;;  %p2843_p3 = scmp.lt.u32.totalorder %s2841_s29, %s2836_s2 }
  0xac   : > { %p2839_p13 = pnand %p2838_p8, %p2837_p12  ;;  %p2845_p5 = scmp.lt.u32.totalorder %s2836_s2, %s3251_s10 }
  0xad   : > { %p2844_p2 = por %p2843_p3, %p2842_p1 }
  0xae   : > { %p2840_p0 = pneg %p2839_p13 }
  0xaf   : > { %p2846_p7 = por %p2845_p5, %p2844_p2 }
  0xb1   : > { %p2847_p9 = pnand %p2846_p7, %p2840_p0 }
  0xb3   : > { %2850 = shalt.err (!%p2847_p9)
}
  0xb4   : > { %s2851_s14 = scalar_lea.vmem %s3253_s27, 128  ;;  %s2954_s13 = smov [#allocation2]  }
  0xb5   : > { %p2852_p12 = scmp.ne.s32.totalorder %s3253_s27, %s2851_s14  ;;  %s2856_s11 = sshll.u32 %s2954_s13, 4  ;;  %s2857_s11 = int_to_ptr.vmem [resolvable:$false] %s2856_s11 }
  0xb6   : > { %s2858_s8 = scalar_lea.vmem %s2857_s11, 256  ;;  %p2859_p4 = scmp.lt.s32.totalorder %s3253_s27, %s2857_s11 }
  0xb7   : > { %p2854_p13 = pnand %p2852_p12, %p2838_p8  ;;  %p2860_p1 = scmp.lt.s32.totalorder %s2858_s8, %s2851_s14 }
  0xb9   : > { %p2855_p10 = pneg %p2854_p13  ;;  %p2861_p3 = por %p2860_p1, %p2859_p4 }
  0xbb   : > { %p2862_p2 = pnand %p2861_p3, %p2855_p10 }
  0xbd   : > { %2865 = shalt.err (!%p2862_p2)
}
  0xbe   : > { %2582 = dma.hbm_to_vmem [thread:$0]  (!%p3257_p11), %s3251_s10, 128, %s3253_s27, %s397_s25  }
  0xbf   : > { %p3568_p0 = scmp.ne.s32.totalorder %s3557_s24, 0 }
  0xc0   : > { %s3289_s2 = sand.u32 (!%p3568_p0), 1, %s2936_s18  }
  0xc1   : > { %423 = sbr.rel (%p3568_p0) target bundleno = 2476 (0x9ac), region = 64  ;;  %s2284_s29 = sshll.u32 (!%p3568_p0), %s3289_s2, 3 }
  0xc2   : > { %s426_s22 = scalar_lea.sflag (!%p3568_p0), [#allocation3], %s3289_s2  ;;  %s3295_s21 = scalar_lea.vmem (!%p3568_p0), [#allocation2], %s2284_s29 }
  0xc8   : > { %2911 = dma.done.wait (%p3232_p6), %s426_s22, 128  }
  0xc9   : > { %2913 = vsyncadd (%p3232_p6), %s426_s22, 4294967168  ;;  %p3569_p4 = scmp.eq.s32.totalorder %s3047_s23, 0 }
  0xcb   : > { %2915 = dma.done.wait (%p3569_p4), [#allocation6], 528   ;;  %p3570_p10 = pmov %p3569_p4 }
  0xcc   : > { %p3571_p11 = pmov %p3569_p4 }
  0xcd   : > { %2917 = vsyncadd (%p3570_p10), [#allocation6], 4294966768 }
  0xce   : > { %2919 = dma.done.wait (%p3571_p11), [#allocation9], 528   ;;  %p3572_p8 = pmov %p3569_p4 }
  0xcf   : > { %p3573_p5 = pmov %p3569_p4 }
  0xd0   : > { %2921 = vsyncadd (%p3572_p8), [#allocation9], 4294966768 }
  0xd1   : > { %2923 = dma.done.wait (%p3573_p5), [#allocation12], 528   ;;  %p3574_p7 = pmov %p3569_p4 }
  0xd2   : > { %v2955_v0 = vmov 0.0|0.0   ;;  %p496_p6 = scmp.lt.s32.totalorder %s3047_s23, 1  ;;  %vm2956_vm0 = vmmov 0   ;;  %v2957_v1 = vmov 0.0   ;;  %v2958_v2 = vmov 0   ;;  %v502_v3 = vld [vmem:[#allocation5] sm:$0xff] }
  0xd3   : > { %2925 = vsyncadd (%p3574_p7), [#allocation12], 4294966768  ;;  %2508 = vmatprep.subr.bf16.mxu0 %v2955_v0  ;;  %2514 = vmatprep.subr.bf16.mxu1 %v2955_v0  ;;  %v503_v4 = vld [vmem:[#allocation5 + $0x8] sm:$0xff]  ;;  %v587_v5 = vld [vmem:[%s3538_s4] sm:$0xff]  ;;  %vm513_vm1 = vcmask 261120   ;;  %s3575_s15 = sld [smem:[#allocation21_spill]] }
  0xd4   : > { %2392 = vmatprep.mubr.msk.f32.mxu0 %vm2956_vm0, %v2957_v1  ;;  %2403 = vmatprep.mubr.msk.f32.mxu1 %vm2956_vm0, %v2957_v1  ;;  %s497_s24 = scalar_select %p496_p6, %s3047_s23, 1  ;;  %v2509_v6 = vpack.c.bf16 %v503_v4, %v502_v3  ;;  %v588_v7 = vld [vmem:[%s3538_s4 + $0x8] sm:$0xff]  ;;  %v504_v8 = vld [vmem:[#allocation5 + $0x10] sm:$0xff]  ;;  %v589_v11 = vld [vmem:[%s3538_s4 + $0x10] sm:$0xff]  ;;  %vm757_vm2 = vcmask 64512   ;;  %vm993_vm3 = vcmask 1043456  }
  0xd5   : > { %2651 = vset.pattern.permute.xlu0 %v2958_v2  ;;  %v505_v9 = vld [vmem:[#allocation5 + $0x18] sm:$0xff]  ;;  %v2515_v10 = vpack.c.bf16 %v588_v7, %v587_v5  ;;  %v590_v12 = vld [vmem:[%s3538_s4 + $0x18] sm:$0xff]  ;;  %v2293_v23 = vld [vmem:[#allocation7] ss:$0 sm:$0xff]  ;;  %s2960_s25 = smov 112   ;;  %vm978_vm4 = vcmask 31744  }
  0xd6   : > { %s2292_s12 = sshll.u32 %s497_s24, 3  ;;  %2510 = vmatpush3.bf16.msra.mxu0 %v2509_v6  ;;  %v2512_v13 = vpack.c.bf16 %v505_v9, %v504_v8  ;;  %v2518_v14 = vpack.c.bf16 %v590_v12, %v589_v11  ;;  %v668_v15 = vld [vmem:[#allocation10] sm:$0xff]  ;;  %v669_v16 = vld [vmem:[#allocation10 + $0x8] sm:$0xff]  ;;  %v670_v20 = vld [vmem:[#allocation10 + $0x10] sm:$0xff]  ;;  %s2961_s22 = smov 104   ;;  %vm2030_vm5 = vcmask 130048  }
  0xd7   : > { %s499_s11 = scalar_lea.vmem %s3535_s1, %s2292_s12  ;;  %2516 = vmatpush3.bf16.msra.mxu1 %v2515_v10  ;;  %2511 = vmatprep.subr.bf16.mxu0 %v2955_v0  ;;  %v500_v18 = vld [vmem:[%s3295_s21] sm:$0xff]  ;;  %v2521_v19 = vpack.c.bf16 %v669_v16, %v668_v15  ;;  %v2295_v24 = vld [vmem:[#allocation8] ss:$0 sm:$0xff]  ;;  %s2959_s21 = smov 120   ;;  %v2297_v34 = vld [vmem:[#allocation11] ss:$0 sm:$0xff] }
  0xd8   : > { %v501_v17 = vld [vmem:[%s499_s11] sm:$0xff]  ;;  %2517 = vmatprep.subr.bf16.mxu1 %v2955_v0  ;;  %v671_v21 = vld [vmem:[#allocation10 + $0x18] sm:$0xff]  ;;  %s2963_s12 = smov 16   ;;  %s2964_s27 = smov 24   ;;  %vm2032_vm6 = vcmask 195584  }
  0xd9   : > { %751 = vperm.xlu0 %2651, %v501_v17   ;;  %v2524_v22 = vpack.c.bf16 %v671_v21, %v670_v20  ;;  %v756_v33 = vld [vmem:[%s3575_s15] sm:$0xf]  ;;  %v3375_v39 = vld [vmem:[%s3575_s15 + $0x4] sm:$0xf]  ;;  %v3398_v49 = vld [vmem:[%s3575_s15 + $0x8] sm:$0xf] }
  0xda   : > { %2513 = vmatpush3.bf16.msra.mxu0 %v2512_v13  ;;  %v3423_v7 = vld [vmem:[%s3575_s15 + $0xc] sm:$0xf]  ;;  %s3576_s13 = sld [smem:[#allocation22_spill]]  ;;  %s2329_s11 = sshll.u32 %s3047_s23, 7 }
  0xdb   : > { %2519 = vmatpush3.bf16.msra.mxu1 %v2518_v14  ;;  %2520 = vmatprep.subr.bf16.mxu0 %v2955_v0  ;;  %s495_s8 = scalar_lea.vmem [#allocation14], %s2284_s29  ;;  %p3578_p12 = scmp.ne.s32.totalorder %s3565_s30, 0 }
  0xdc   : > { %2417 = vmatprep.subr.mxu1 %v2957_v1  ;;  %s2965_s29 = smov [#allocation14]  }
  0xdd   : > { %2393 = vmatmul.mubr.msk.f32.vlgmr.msra.gmra.mrb[0].mxu0 %vm513_vm1, %v500_v18 }
  0xde   : > { %2404 = vmatmul.mubr.msk.f32.vlgmr.msra.gmra.mrb[0].mxu1 %vm513_vm1, %v500_v18  ;;  %2522 = vmatpush3.bf16.msra.mxu0 %v2521_v19 }
  0xdf   : > { %2523 = vmatprep.subr.bf16.mxu0 %v2955_v0  ;;  %2414 = vmatprep.mubr.msk.f32.mxu0 %vm2956_vm0, %v2957_v1 }
  0xe0   : > { %2419 = vmatprep.mubr.msk.f32.mxu1 %vm2956_vm0, %v2957_v1 }
  0xe2   : > { %2525 = vmatpush3.bf16.msra.mxu0 %v2524_v22 }
  0xe3   : > { %2437 = vmatprep.subr.mxu0 %v2957_v1 }
  0xe5   : > { %2415 = vmatmul.mubr.msk.f32.vlgmr.msra.gmra.mrb[2].mxu0 %vm513_vm1, %v500_v18 }
  0xe6   : > { %2439 = vmatprep.mubr.msk.f32.mxu0 %vm2956_vm0, %v2957_v1 }
 0x158   : > { %v752_v26 = vpop.permute.xlu0 %751 }
 0x1b0   : > { %v583_v25 = vpop.f32.mrb[0].mxu0 }
 0x1b1   : > { %v3352_v27 = vadd.f32 %v2293_v23, %v583_v25  ;;  %v664_v28 = vpop.f32.mrb[0].mxu1  ;;  %v2394_v29 = vpop.f32.mrb[1].mxu0 }
 0x1b2   : > { %v665_v30 = vadd.f32 %v2295_v24, %v664_v28  ;;  %v2405_v31 = vpop.f32.mrb[1].mxu1 }
 0x1b3   : > { %1220 = vrot.lane.b32.xlu1 %v3352_v27, %s2959_s21 }
 0x1b4   : > { %v754_v32 = vmul.f32 %v752_v26, %v665_v30 }
 0x1b6   : > { %1070 = vrot.lane.b32.xlu0 %v754_v32, %s2959_s21  ;;  %2418 = vmatpush3.msra.mxu1 %v754_v32 }
 0x1b7   : > { %2420 = vmatmul.mubr.msk.f32.vlgmr.msra.gmra.mrb[2].mxu1 %vm757_vm2, %v756_v33  ;;  %1387 = vrot.lane.b32.xlu1 %v754_v32, %s2960_s25 }
 0x1b8   : > { %v745_v35 = vpop.f32.mrb[2].mxu0  ;;  %2422 = vmatprep.subr.mxu1 %v2957_v1  ;;  %2424 = vmatprep.mubr.msk.f32.mxu1 %vm2956_vm0, %v2957_v1 }
 0x1b9   : > { %v746_v36 = vadd.f32 %v2297_v34, %v745_v35  ;;  %v2416_v37 = vpop.f32.mrb[3].mxu0 }
 0x1bb   : > { %v3365_v38 = vmul.f32 %v752_v26, %v746_v36 }
 0x1bd   : > { %2423 = vmatpush3.msra.mxu1 %v3365_v38 }
 0x1be   : > { %2425 = vmatmul.mubr.msk.f32.vlgmr.msra.gmra.mrb[4].mxu1 %vm757_vm2, %v756_v33  ;;  %2427 = vmatprep.subr.mxu1 %v2957_v1 }
 0x1bf   : > { %2429 = vmatprep.mubr.msk.f32.mxu1 %vm2956_vm0, %v2957_v1 }
 0x225   : > { %v1221_v45 = vpop.permute.xlu1 %1220 }
 0x228   : > { %v1071_v40 = vpop.permute.xlu0 %1070 }
 0x229   : > { %2438 = vmatpush3.msra.mxu0 %v1071_v40  ;;  %v1388_v48 = vpop.permute.xlu1 %1387 }
 0x22a   : > { %2440 = vmatmul.mubr.msk.f32.vlgmr.msra.gmra.mrb[4].mxu0 %vm757_vm2, %v3375_v39  ;;  %2447 = vmatprep.subr.mxu0 %v2957_v1 }
 0x22b   : > { %2449 = vmatprep.mubr.msk.f32.mxu0 %vm2956_vm0, %v2957_v1 }
 0x28a   : > { %v827_v41 = vpop.f32.mrb[2].mxu1 }
 0x28b   : > { %2428 = vmatpush3.xpose.msk.msra.mxu1 %vm757_vm2, %v827_v41  ;;  %v2421_v42 = vpop.f32.mrb[3].mxu1 }
 0x28c   : > { %2432 = vmatprep.subr.mxu1 %v2957_v1 }
 0x28e   : > { %2430 = vmatmul.mubr.msk.f32.vlgmr.msra.gmra.mrb[6].mxu1 %vm757_vm2, %v3352_v27 }
 0x28f   : > { %2434 = vmatprep.mubr.msk.f32.mxu1 %vm2956_vm0, %v2957_v1 }
 0x291   : > { %v897_v43 = vpop.f32.mrb[4].mxu1 }
 0x292   : > { %v2426_v44 = vpop.f32.mrb[5].mxu1  ;;  %2433 = vmatpush3.msk.msra.mxu1 %vm993_vm3, %v897_v43 }
 0x293   : > { %2442 = vmatprep.subr.mxu1 %v2957_v1 }
 0x2fd   : > { %v1142_v46 = vpop.f32.mrb[4].mxu0 }
 0x2fe   : > { %2448 = vmatpush3.xpose.msk.msra.mxu0 %vm757_vm2, %v1142_v46  ;;  %v2441_v47 = vpop.f32.mrb[5].mxu0 }
 0x2ff   : > { %2457 = vmatprep.subr.mxu0 %v2957_v1 }
 0x301   : > { %2450 = vmatmul.mubr.msk.f32.vlgmr.msra.gmra.mrb[6].mxu0 %vm757_vm2, %v1221_v45 }
 0x302   : > { %2458 = vmatpush3.msra.mxu0 %v1388_v48  ;;  %2459 = vmatprep.mubr.msk.f32.mxu0 %vm2956_vm0, %v2957_v1 }
 0x303   : > { %2467 = vmatprep.subr.mxu0 %v2957_v1 }
 0x305   : > { %2460 = vmatmul.mubr.msk.f32.vlgmr.msra.gmra.mrb[8].mxu0 %vm757_vm2, %v3398_v49 }
 0x306   : > { %2469 = vmatprep.mubr.msk.f32.mxu0 %vm2956_vm0, %v2957_v1 }
 0x361   : > { %v973_v50 = vpop.f32.mrb[6].mxu1 }
 0x362   : > { %v977_v51 = vmul.f32 0.35355338, %v973_v50  ;;  %v2431_v52 = vpop.f32.mrb[7].mxu1 }
 0x364   : > { %v979_v53 = vsel %vm978_vm4, %v977_v51, -inf }
 0x365   : > { %980 = vmax.xlane.f32.xlu0 %v979_v53 }
 0x37b   : > { %1147 = vrot.lane.b32.xlu0 %v3365_v38, %s2959_s21  ;;  %s2962_s21 = smov 8  }
 0x37f   : > { %1703 = vrot.lane.b32.xlu0 %v754_v32, %s2961_s22 }
 0x3d4   : > { %v1293_v54 = vpop.f32.mrb[6].mxu0 }
 0x3d5   : > { %v2451_v55 = vpop.f32.mrb[7].mxu0  ;;  %v1297_v63 = vmul.f32 0.35355338, %v1293_v54 }
 0x3d7   : > { %v1298_v2 = vsel %vm978_vm4, %v1297_v63, -inf }
 0x3d8   : > { %v1459_v61 = vpop.f32.mrb[8].mxu0 }
 0x3d9   : > { %2468 = vmatpush3.xpose.msk.msra.mxu0 %vm757_vm2, %v1459_v61  ;;  %v2461_v62 = vpop.f32.mrb[9].mxu0 }
 0x3da   : > { %2477 = vmatprep.subr.mxu0 %v2957_v1  ;;  %v2037_v62 = vld [vmem:[#allocation13 + $0x18] sm:$0xff] }
 0x3f2   : > { %v981_v56 = vpop.xlane.xlu0 %980 }
 0x3f3   : > { %v982_v57 = vsub.f32 %v977_v51, %v981_v56 }
 0x3f5   : > { %v983_v58 = vmul.f32 1.442695, %v982_v57 }
 0x3f6   : > { %v1148_v3 = vpop.permute.xlu0 %1147 }
 0x3f7   : > { %2652 = vpow2.f32 %v983_v58  ;;  %v2034_v58 = vld [vmem:[#allocation13] sm:$0xff] }
 0x3fa   : > { %v1704_v6 = vpop.permute.xlu0 %1703 }
 0x401   : > { %v2653_v59 = vpop.eup %2652 }
 0x402   : > { %v985_v60 = vsel %vm978_vm4, %v2653_v59, 0.0 }
 0x403   : > { %986 = vadd.xlane.f32.xlu1 %v985_v60  ;;  %v2036_v60 = vld [vmem:[#allocation13 + $0x10] sm:$0xff] }
 0x414   : > { %1536 = vrot.lane.b32.xlu1 %v3352_v27, %s2960_s25 }
 0x438   : > { %1299 = vmax.xlane.f32.xlu1 %v1298_v2 }
 0x449   : > { %1852 = vrot.lane.b32.xlu1 %v3352_v27, %s2961_s22 }
 0x490   : > { %v987_v4 = vpop.xlane.xlu1 %986 }
 0x491   : > { %2654 = vrcp.f32 %v987_v4 }
 0x494   : > { %v1537_v5 = vpop.permute.xlu1 %1536 }
 0x495   : > { %2470 = vmatmul.mubr.msk.f32.vlgmr.msra.gmra.mrb[10].mxu0 %vm757_vm2, %v1537_v5 }
 0x496   : > { %2478 = vmatpush3.msra.mxu0 %v1704_v6  ;;  %2479 = vmatprep.mubr.msk.f32.mxu0 %vm2956_vm0, %v2957_v1 }
 0x497   : > { %2487 = vmatprep.subr.mxu0 %v2957_v1 }
 0x499   : > { %2480 = vmatmul.mubr.msk.f32.vlgmr.msra.gmra.mrb[12].mxu0 %vm757_vm2, %v3423_v7 }
 0x49a   : > { %2489 = vmatprep.mubr.msk.f32.mxu0 %vm2956_vm0, %v2957_v1 }
 0x49b   : > { %v2655_v8 = vpop.eup %2654 }
 0x49c   : > { %v989_v9 = vmul.f32 %v2655_v8, %v2653_v59  ;;  %v2035_v59 = vld [vmem:[#allocation13 + $0x8] sm:$0xff] }
 0x49d   : > { %v2527_v61 = vpack.c.bf16 %v2035_v59, %v2034_v58 }
 0x49e   : > { %2435 = vmatmul.mubr.msk.f32.vlgmr.msra.gmra.mrb[8].mxu1 %vm978_vm4, %v989_v9 }
 0x49f   : > { %2443 = vmatpush3.msra.mxu1 %v1148_v3  ;;  %2444 = vmatprep.mubr.msk.f32.mxu1 %vm2956_vm0, %v2957_v1 }
 0x4a0   : > { %2452 = vmatprep.subr.mxu1 %v2957_v1 }
 0x4a2   : > { %2445 = vmatmul.mubr.msk.f32.vlgmr.msra.gmra.mrb[10].mxu1 %vm757_vm2, %v3375_v39 }
 0x4a3   : > { %2454 = vmatprep.mubr.msk.f32.mxu1 %vm2956_vm0, %v2957_v1 }
 0x4c5   : > { %v1300_v10 = vpop.xlane.xlu1 %1299 }
 0x4c6   : > { %v1301_v11 = vsub.f32 %v1297_v63, %v1300_v10  ;;  %v2530_v63 = vpack.c.bf16 %v2037_v62, %v2036_v60 }
 0x4c8   : > { %v1302_v12 = vmul.f32 1.442695, %v1301_v11 }
 0x4c9   : > { %v1853_v22 = vpop.permute.xlu1 %1852 }
 0x4ca   : > { %2656 = vpow2.f32 %v1302_v12 }
 0x4d4   : > { %v2657_v13 = vpop.eup %2656 }
 0x4d5   : > { %v1304_v14 = vsel %vm978_vm4, %v2657_v13, 0.0 }
 0x4d6   : > { %1305 = vadd.xlane.f32.xlu0 %v1304_v14 }
 0x4ec   : > { %1463 = vrot.lane.b32.xlu0 %v3365_v38, %s2960_s25  ;;  %s2870_s25 = sshll.u32 %s2965_s29, 4  ;;  %s2871_s25 = int_to_ptr.vmem [resolvable:$false] %s2870_s25 }
 0x4ed   : > { %s2872_s14 = scalar_lea.vmem %s2871_s25, 256 }
 0x563   : > { %v1306_v15 = vpop.xlane.xlu0 %1305 }
 0x564   : > { %2658 = vrcp.f32 %v1306_v15 }
 0x567   : > { %v1464_v29 = vpop.permute.xlu0 %1463 }
 0x568   : > { %v1609_v16 = vpop.f32.mrb[10].mxu0 }
 0x569   : > { %v1613_v17 = vmul.f32 0.35355338, %v1609_v16  ;;  %v2471_v18 = vpop.f32.mrb[11].mxu0 }
 0x56b   : > { %v1614_v19 = vsel %vm978_vm4, %v1613_v17, -inf }
 0x56c   : > { %1615 = vmax.xlane.f32.xlu1 %v1614_v19  ;;  %v1775_v20 = vpop.f32.mrb[12].mxu0 }
 0x56d   : > { %2488 = vmatpush3.xpose.msk.msra.mxu0 %vm757_vm2, %v1775_v20  ;;  %v2481_v21 = vpop.f32.mrb[13].mxu0 }
 0x56e   : > { %2526 = vmatprep.subr.bf16.mxu0 %v2955_v0  ;;  %v2659_v24 = vpop.eup %2658 }
 0x56f   : > { %v1308_v26 = vmul.f32 %v2659_v24, %v2657_v13 }
 0x570   : > { %2490 = vmatmul.mubr.msk.f32.vlgmr.msra.gmra.mrb[14].mxu0 %vm757_vm2, %v1853_v22 }
 0x571   : > { %v3445_v23 = vpop.f32.mrb[8].mxu1  ;;  %2505 = vmatprep.mubr.msk.f32.mxu0 %vm2956_vm0, %v2957_v1  ;;  %2528 = vmatpush3.bf16.msra.mxu0 %v2527_v61 }
 0x572   : > { %v2436_v25 = vpop.f32.mrb[9].mxu1  ;;  %2529 = vmatprep.subr.bf16.mxu0 %v2955_v0  ;;  %v2326_v0 = vld [vmem:[%s3576_s13] ss:$0 sm:$0xff] }
 0x575   : > { %v1216_v27 = vpop.f32.mrb[10].mxu1  ;;  %2531 = vmatpush3.bf16.msra.mxu0 %v2530_v63 }
 0x576   : > { %2453 = vmatpush3.msk.msra.mxu1 %vm993_vm3, %v1216_v27  ;;  %v2446_v28 = vpop.f32.mrb[11].mxu1 }
 0x577   : > { %2455 = vmatmul.mubr.msk.f32.vlgmr.msra.gmra.mrb[12].mxu1 %vm978_vm4, %v1308_v26  ;;  %2462 = vmatprep.subr.mxu1 %v2957_v1 }
 0x578   : > { %2463 = vmatpush3.msra.mxu1 %v1464_v29  ;;  %2464 = vmatprep.mubr.msk.f32.mxu1 %vm2956_vm0, %v2957_v1 }
 0x579   : > { %2472 = vmatprep.subr.mxu1 %v2957_v1 }
 0x57b   : > { %2465 = vmatmul.mubr.msk.f32.vlgmr.msra.gmra.mrb[14].mxu1 %vm757_vm2, %v3398_v49 }
 0x57c   : > { %2474 = vmatprep.mubr.msk.f32.mxu1 %vm2956_vm0, %v2957_v1 }
 0x5f9   : > { %v1616_v30 = vpop.xlane.xlu1 %1615 }
 0x5fa   : > { %v1617_v31 = vsub.f32 %v1613_v17, %v1616_v30 }
 0x5fc   : > { %v1618_v32 = vmul.f32 1.442695, %v1617_v31 }
 0x5fe   : > { %2660 = vpow2.f32 %v1618_v32 }
 0x608   : > { %v2661_v33 = vpop.eup %2660 }
 0x609   : > { %v1620_v34 = vsel %vm978_vm4, %v2661_v33, 0.0 }
 0x60a   : > { %1621 = vadd.xlane.f32.xlu0 %v1620_v34 }
 0x620   : > { %1779 = vrot.lane.b32.xlu0 %v3365_v38, %s2961_s22  ;;  %s2133_s22 = sshll.u32 %s495_s8, 4  ;;  %s3491_s22 = int_to_ptr.vmem [resolvable:$true] %s2133_s22 }
 0x621   : > { %s2866_s23 = scalar_lea.vmem %s3491_s22, 128  ;;  %p2873_p3 = scmp.lt.s32.totalorder %s3491_s22, %s2871_s25 }
 0x622   : > { %p2867_p9 = scmp.ne.s32.totalorder %s3491_s22, %s2866_s23  ;;  %p2874_p2 = scmp.lt.s32.totalorder %s2872_s14, %s2866_s23 }
 0x624   : > { %p2868_p13 = pnand %p2867_p9, %p3578_p12  ;;  %p2875_p0 = por %p2874_p2, %p2873_p3 }
 0x626   : > { %p2869_p1 = pneg %p2868_p13 }
 0x628   : > { %p2876_p4 = pnand %p2875_p0, %p2869_p1 }
 0x643   : > { %v1925_v35 = vpop.f32.mrb[14].mxu0 }
 0x644   : > { %v1929_v36 = vmul.f32 0.35355338, %v1925_v35  ;;  %v2491_v37 = vpop.f32.mrb[15].mxu0 }
 0x646   : > { %v1930_v39 = vsel %vm978_vm4, %v1929_v36, -inf }
 0x647   : > { %1931 = vmax.xlane.f32.xlu1 %v1930_v39 }
 0x64a   : > { %v1381_v40 = vpop.f32.mrb[12].mxu1 }
 0x64b   : > { %v2456_v41 = vpop.f32.mrb[13].mxu1 }
 0x64e   : > { %v1532_v42 = vpop.f32.mrb[14].mxu1 }
 0x64f   : > { %2473 = vmatpush3.msk.msra.mxu1 %vm993_vm3, %v1532_v42  ;;  %v2466_v43 = vpop.f32.mrb[15].mxu1 }
 0x650   : > { %2482 = vmatprep.subr.mxu1 %v2957_v1 }
 0x697   : > { %v1622_v44 = vpop.xlane.xlu0 %1621 }
 0x698   : > { %2662 = vrcp.f32 %v1622_v44 }
 0x69b   : > { %v1780_v47 = vpop.permute.xlu0 %1779 }
 0x6a2   : > { %v2663_v45 = vpop.eup %2662 }
 0x6a3   : > { %v1624_v46 = vmul.f32 %v2663_v45, %v2661_v33 }
 0x6a5   : > { %2475 = vmatmul.mubr.msk.f32.vlgmr.msra.gmra.mrb[16].mxu1 %vm978_vm4, %v1624_v46 }
 0x6a6   : > { %2483 = vmatpush3.msra.mxu1 %v1780_v47  ;;  %2484 = vmatprep.mubr.msk.f32.mxu1 %vm2956_vm0, %v2957_v1 }
 0x6a7   : > { %2492 = vmatprep.subr.mxu1 %v2957_v1 }
 0x6a9   : > { %2485 = vmatmul.mubr.msk.f32.vlgmr.msra.gmra.mrb[18].mxu1 %vm757_vm2, %v3423_v7 }
 0x6aa   : > { %2494 = vmatprep.mubr.msk.f32.mxu1 %vm2956_vm0, %v2957_v1 }
 0x6d4   : > { %v1932_v38 = vpop.xlane.xlu1 %1931 }
 0x6d5   : > { %v1933_v48 = vsub.f32 %v1929_v36, %v1932_v38 }
 0x6d7   : > { %v1934_v49 = vmul.f32 1.442695, %v1933_v48 }
 0x6d9   : > { %2664 = vpow2.f32 %v1934_v49 }
 0x6e3   : > { %v2665_v50 = vpop.eup %2664 }
 0x6e4   : > { %v1936_v51 = vsel %vm978_vm4, %v2665_v50, 0.0 }
 0x6e5   : > { %1937 = vadd.xlane.f32.xlu1 %v1936_v51 }
 0x6f6   : > { %2018 = vrot.lane.b32.xlu1 %v1381_v40, %s2962_s21  ;;  %s3577_s21 = sld [smem:[#allocation23_spill]] }
 0x772   : > { %v1938_v52 = vpop.xlane.xlu1 %1937 }
 0x773   : > { %2666 = vrcp.f32 %v1938_v52 }
 0x776   : > { %v2019_v4 = vpop.permute.xlu1 %2018 }
 0x777   : > { %v2029_v6 = vsel %vm757_vm2, %v3445_v23, %v2019_v4 }
 0x778   : > { %v1697_v53 = vpop.f32.mrb[16].mxu1 }
 0x779   : > { %2022 = vrot.lane.b32.xlu0 %v1697_v53, %s2963_s12  ;;  %v2476_v54 = vpop.f32.mrb[17].mxu1  ;;  %s3489_s12 = scalar_lea.hbm %s3577_s21, %s2329_s11 }
 0x77c   : > { %v1848_v55 = vpop.f32.mrb[18].mxu1 }
 0x77d   : > { %v2667_v56 = vpop.eup %2666  ;;  %v2486_v57 = vpop.f32.mrb[19].mxu1  ;;  %2493 = vmatpush3.msk.msra.mxu1 %vm993_vm3, %v1848_v55 }
 0x77e   : > { %v1940_v1 = vmul.f32 %v2667_v56, %v2665_v50 }
 0x780   : > { %2495 = vmatmul.mubr.msk.f32.vlgmr.msra.gmra.mrb[20].mxu1 %vm978_vm4, %v1940_v1 }
 0x7eb   : > { %v2023_v5 = vpop.permute.xlu0 %2022 }
 0x7ec   : > { %v2031_v7 = vsel %vm2030_vm5, %v2029_v6, %v2023_v5 }
 0x853   : > { %v2013_v2 = vpop.f32.mrb[20].mxu1 }
 0x854   : > { %2026 = vrot.lane.b32.xlu0 %v2013_v2, %s2964_s27  ;;  %v2496_v3 = vpop.f32.mrb[21].mxu1  ;;  %s2120_s27 = scalar_lea.sflag [#allocation4], %s3289_s2 }
 0x8c6   : > { %v2027_v8 = vpop.permute.xlu0 %2026 }
 0x8c7   : > { %v2033_v9 = vsel %vm2032_vm6, %v2031_v7, %v2027_v8 }
 0x8c8   : > { %2506 = vmatmul.mubr.msk.f32.vlgmr.msra.gmra.mrb[16].mxu0 %vm513_vm1, %v2033_v9 }
 0x99b   : > { %v2114_v10 = vpop.f32.mrb[16].mxu0 }
 0x99c   : > { %v2115_v11 = vadd.f32 %v2326_v0, %v2114_v10  ;;  %v2507_v12 = vpop.f32.mrb[17].mxu0 }
 0x99e   : > { %2118 = vst.msk [vmem:[%s495_s8] sm:$0xff] %vm513_vm1, %v2115_v11 }
 0x99f   : > { %2879 = shalt.err (!%p2876_p4)
}
 0x9a0   : > { %s2880_s2 = scalar_lea.hbm %s3489_s12, 128  ;;  %s2884_s8 = scalar_lea.hbm %s3577_s21, 256 }
 0x9a1   : > { %p2881_p10 = scmp.ne.s32.totalorder %s3489_s12, %s2880_s2  ;;  %p2885_p5 = scmp.lt.u32.totalorder %s3489_s12, %s3577_s21 }
 0x9a2   : > { %p2886_p7 = scmp.lt.u32.totalorder %s2884_s8, %s2880_s2  ;;  %p2888_p9 = scmp.lt.u32.totalorder %s2880_s2, %s3489_s12 }
 0x9a3   : > { %p2882_p11 = pnand %p2881_p10, %p3578_p12 }
 0x9a4   : > { %p2887_p6 = por %p2886_p7, %p2885_p5 }
 0x9a5   : > { %p2883_p8 = pneg %p2882_p11 }
 0x9a6   : > { %p2889_p13 = por %p2888_p9, %p2887_p6 }
 0x9a8   : > { %p2890_p1 = pnand %p2889_p13, %p2883_p8 }
 0x9aa   : > { %2893 = shalt.err (!%p2890_p1)
}
 0x9ab   : > { %2558 = dma.vmem_to_hbm [thread:$0]  (%p3578_p12), %s3491_s22, 128, %s3489_s12, %s2120_s27  }
 0x9ac PF: > { %s2145_s23 = sand.u32 1, %s2932_s17   ;;  %p3579_p3 = scmp.ne.s32.totalorder %s3566_s26, 0 }
 0x9ad   : > { %p3580_p2 = scmp.ge.s32.totalorder %s2944_s20, 2  ;;  %s2146_s29 = scalar_lea.sflag [#allocation4], %s2145_s23 }
 0x9af   : > { %p2584_p0 = pnand %p3580_p2, %p3579_p3 }
 0x9b1   : > { %2927 = dma.done.wait (!%p2584_p0), %s2146_s29, 128  }
 0x9b2   : > { %2929 = vsyncadd (!%p2584_p0), %s2146_s29, 4294967168  ;;  %p27_p4 = scmp.ge.s32.totalorder %s3213_s16, 4   ;;  %s3581_s17 = smov %s2936_s18 }
 0x9b3   : > { %s3582_s18 = smov %s2940_s19  ;;  %s3583_s19 = smov %s3224_s28 }
 0x9b4   : > { %s3584_s20 = smov %s3213_s16  ;;  %29 = sbr.rel (!%p27_p4) target bundleno = 13 (0xd), region = 139 }
 0x9bb   :  { %2151 = vsyncpa [#allocation3], 1 }
 0x9bc   :  { %2153 = vsyncpa [#allocation3 + $0x1], 1 }
 0x9bd   :  { %2154 = vsyncpa [#allocation6], 1 }
 0x9be   :  { %2155 = vsyncpa [#allocation9], 1 }
 0x9bf   :  { %2156 = vsyncpa [#allocation12], 1 }
 0x9c0   :  { %2157 = vsyncpa [#allocation4], 1 }
 0x9c1   :  { %2159 = vsyncpa [#allocation4 + $0x1], 1 }

</bundles_post_ra>
